<compile_context>
chip_gen: v7x
topology: tpu7x:2x2x1
jax: 0.10.0
libtpu: 0.0.40
codegen_flags: <defaults>
</compile_context>

<pallas_src>
import functools

import jax
import jax.numpy as jnp
from jax.experimental import pallas as pl
from jax.experimental.pallas import tpu as pltpu


# ----------------------------------------------------------------------------- helpers


def _vmem_capacity_bytes():
    """Physical VMEM of the current chip (fallback: v7x per-TensorCore 64 MiB)."""
    try:
        info = pltpu.get_tpu_info()
        cap = getattr(info, "vmem_capacity_bytes", None)
        if cap:
            return int(cap)
    except Exception:
        pass
    return 64 << 20


def _pick_ho_tile(Ho, C, k, W, itemsize, budget_bytes, B):
    """Output-row tile (multiple of 8, or full Ho when Ho < 8) sized to a VMEM budget,
    with >= 2 parallel grid steps so megacore / v7x's 2 TensorCores both get work."""
    if Ho <= 8:
        return Ho
    per_row = C * k * W * itemsize                    # input bytes per pooled output row
    t = max(8, (budget_bytes // max(per_row, 1)) // 8 * 8)
    t = min(t, (Ho // 8) * 8)
    while B * (-(-Ho // t)) < 2 and t > 8:            # ensure >= 2 grid steps
        t = max(8, (t // 2) // 8 * 8)
    return t


def _constant_stats(H, W, k):
    """[2D+1, Ho, Wo] density/variance/norm_center in f32 — coordinate-only, hence
    constant for the dense fully-occupied case.  Computed once in pure JAX."""
    D = 2
    Ho, Wo = H // k, W // k
    ii, jj = jnp.meshgrid(jnp.arange(H, dtype=jnp.float32),
                          jnp.arange(W, dtype=jnp.float32), indexing="ij")
    coords = jnp.stack([ii, jj], -1).reshape(Ho, k, Wo, k, D)
    cnt = float(k * k)                                   # sum_pool(ones) per window
    total = float(H * W)                                 # glob_sum_pool(ones)
    density = jnp.full((1, Ho, Wo), cnt / total, jnp.float32)
    center = coords.mean(axis=(1, 3))                    # mean_pool(coords)   [Ho,Wo,D]
    diff = coords - center[:, None, :, None, :]          # coords - unpool(center)
    variance = (diff * diff).sum(axis=(1, 3)) / cnt      # sum_pool(diff^2)/pool_xx
    oi, oj = jnp.meshgrid(jnp.arange(Ho, dtype=jnp.float32) * k,
                          jnp.arange(Wo, dtype=jnp.float32) * k, indexing="ij")
    outc = jnp.stack([oi, oj], -1)                       # stride-aligned output coords
    norm_center = center - outc
    return jnp.concatenate([density,
                            variance.transpose(2, 0, 1),
                            norm_center.transpose(2, 0, 1)], axis=0)   # [2D+1,Ho,Wo]


# ----------------------------------------------------------------------------- kernel


def _decimate_lanes(m2, k, Wo, chunk_cols):
    """m2: [R, Wc] f32 -> [R, Wo] picking lane k*w for output column w.
    Done as chunked one-hot matmuls on the (otherwise idle) MXU; exact with HIGHEST."""
    Wc = m2.shape[-1]
    outs = []
    for w0 in range(0, Wo, chunk_cols):
        cw = min(chunk_cols, Wo - w0)
        sw = min(k * cw, Wc - k * w0)                  # source lanes needed for this chunk
        src = m2[:, k * w0:k * w0 + sw]
        rows = jax.lax.broadcasted_iota(jnp.int32, (sw, cw), 0)
        cols = jax.lax.broadcasted_iota(jnp.int32, (sw, cw), 1)
        sel = (rows == cols * k).astype(jnp.float32)   # one-hot selection matrix
        outs.append(jnp.dot(src, sel,
                            preferred_element_type=jnp.float32,
                            precision=jax.lax.Precision.HIGHEST))
    return outs[0] if len(outs) == 1 else jnp.concatenate(outs, axis=-1)


def _statspool_kernel(x_ref, stats_ref, o_ref, *, C, k, W, Wo, dec_chunk, aligned):
    # x_ref:     [C, Ho_t, k*W]   — the k rows of every window packed into one lane row.
    # stats_ref: [2D+1, Ho_t, Wo] — constant coordinate stats (already in output dtype).
    # o_ref:     [C + 2D+1, Ho_t, Wo]
    n_stats = stats_ref.shape[0]
    ho_t = x_ref.shape[1]
    Wc = W - (k - 1)                                   # common width of shifted slices

    x = x_ref[...]
    # k*k window max as elementwise maxima of static lane slices (no rolls, no strides).
    m = None
    for dy in range(k):
        for dx in range(k):
            s = x[:, :, dy * W + dx: dy * W + dx + Wc]
            m = s if m is None else jnp.maximum(m, s)
    m = m.astype(jnp.float32)                          # [C, Ho_t, Wc]; lane k*wo = window max

    if k == 1:
        pooled = m                                     # identity pooling
    elif aligned:                                      # Ho_t % 8 == 0: free leading regroups
        m2 = m.reshape(C * ho_t, Wc)
        p2 = _decimate_lanes(m2, k, Wo, dec_chunk)     # [C*Ho_t, Wo]
        pooled = p2.reshape(C, ho_t, Wo)
    else:                                              # tiny Ho edge case: per-channel matmuls
        pooled = jnp.stack([_decimate_lanes(m[c], k, Wo, dec_chunk) for c in range(C)], axis=0)

    o_ref[pl.ds(0, C), :, :] = pooled.astype(o_ref.dtype)
    o_ref[pl.ds(C, n_stats), :, :] = stats_ref[...]    # fused ME.cat(x, coord_features)


# ----------------------------------------------------------------------------- wrapper


def statspool(x, kernel_size=2, stride=2):
    """x: [B, C, H, W] (NCHW). Returns [B, C + 2*D + 1, H//k, W//k] (NCHW)."""
    # TODO(synk): only non-overlapping dense windows (kernel_size == stride, full occupancy)
    # are supported; a mask-aware variant is needed for true Minkowski sparsity.
    assert kernel_size == stride
    B, C, H, W = x.shape
    k, D = kernel_size, 2
    assert H % k == 0 and W % k == 0
    Ho, Wo = H // k, W // k
    S = 2 * D + 1

    # FREE reshape (row-major regrouping, no data movement): one row per pooled output row.
    x_r = x.reshape(B, C, Ho, k * W)
    # Coordinate-only stats in f32, cast to the output dtype only at the fused concat.
    # TODO(synk): for bf16 features a separate f32 stats tensor would preserve full precision.
    stats = _constant_stats(H, W, k).astype(x.dtype)                  # [S, Ho, Wo]

    itemsize = x.dtype.itemsize
    cap = _vmem_capacity_bytes()
    budget = max(4 << 20, cap // 8)                    # ~16 MiB blocks v5e/v6e, ~8 MiB v7x
    ho_t = _pick_ho_tile(Ho, C, k, W, itemsize, budget, B)
    grid = (B, pl.cdiv(Ho, ho_t))

    # vmem limit derived from the actual (double-buffered) block footprint + intermediates.
    in_b = C * ho_t * k * W * itemsize
    st_b = S * ho_t * Wo * itemsize
    out_b = (C + S) * ho_t * Wo * itemsize
    in_f32 = C * ho_t * k * W * 4
    out_f32 = C * ho_t * Wo * 4
    vmem_limit = int(min(3 * cap // 4,
                         max(32 << 20,
                             2 * (in_b + st_b + out_b) + in_f32 + out_f32 + (8 << 20))))
    # TODO(synk): extremely large C*W (minimum 8-row tile over the VMEM budget) would also
    # need tiling over C / W; not required for the shapes this module is used with.

    kernel = functools.partial(_statspool_kernel, C=C, k=k, W=W, Wo=Wo,
                               dec_chunk=min(Wo, 256), aligned=(ho_t % 8 == 0))

    out = pl.pallas_call(
        kernel,
        out_shape=jax.ShapeDtypeStruct((B, C + S, Ho, Wo), x.dtype),
        grid_spec=pltpu.PrefetchScalarGridSpec(
            num_scalar_prefetch=0,
            grid=grid,
            in_specs=[
                pl.BlockSpec((None, C, ho_t, k * W), lambda b, h: (b, 0, h, 0)),
                pl.BlockSpec((S, ho_t, Wo), lambda b, h: (0, h, 0)),
            ],
            out_specs=pl.BlockSpec((None, C + S, ho_t, Wo), lambda b, h: (b, 0, h, 0)),
        ),
        compiler_params=pltpu.CompilerParams(
            dimension_semantics=("parallel", "parallel"),
            vmem_limit_bytes=vmem_limit,
        ),
    )(x_r, stats)
    return out


# ----------------------------------------------------------------------------- reference


def statspool_ref(x, k):
    """Pure-JAX reference of the dense StatsPool semantics (for verification)."""
    B, C, H, W = x.shape
    D = 2
    Ho, Wo = H // k, W // k
    xh = x.transpose(0, 2, 3, 1).reshape(B, Ho, k, Wo, k, C)
    maxf = xh.max(axis=(2, 4))                                             # [B,Ho,Wo,C]
    density = jnp.full((B, Ho, Wo, 1), (k * k) / float(H * W), jnp.float32)
    ii, jj = jnp.meshgrid(jnp.arange(H, dtype=jnp.float32),
                          jnp.arange(W, dtype=jnp.float32), indexing="ij")
    coords = jnp.stack([ii, jj], -1).reshape(Ho, k, Wo, k, D)
    center = coords.mean(axis=(1, 3))                                      # [Ho,Wo,D]
    diff = coords - center[:, None, :, None, :]
    var = (diff * diff).sum(axis=(1, 3)) / float(k * k)                    # [Ho,Wo,D]
    oi, oj = jnp.meshgrid(jnp.arange(Ho, dtype=jnp.float32) * k,
                          jnp.arange(Wo, dtype=jnp.float32) * k, indexing="ij")
    outc = jnp.stack([oi, oj], -1)                                         # [Ho,Wo,D]
    norm_center = center - outc
    cf = jnp.concatenate([density,
                          jnp.broadcast_to(var, (B, Ho, Wo, D)),
                          jnp.broadcast_to(norm_center, (B, Ho, Wo, D))], -1)
    return jnp.concatenate([maxf.astype(x.dtype).astype(jnp.float32), cf], -1).transpose(0, 3, 1, 2)


if __name__ == "__main__":
    key = jax.random.PRNGKey(0)
    B, C, H, W = 2, 4, 16, 16
    k = 2
    x = jax.random.normal(key, (B, C, H, W), dtype=jnp.float32)

    out = jax.block_until_ready(statspool(x, kernel_size=k, stride=k))

    ref = statspool_ref(x, k)
    assert out.shape == (B, C + 2 * 2 + 1, H // k, W // k), out.shape
    assert jnp.allclose(out.astype(jnp.float32), ref, atol=1e-5, rtol=1e-5), \
        float(jnp.max(jnp.abs(out.astype(jnp.float32) - ref)))

    print("KERNEL_OK")
</pallas_src>

<mosaic_0001>
module attributes {stable_mosaic.version = 11 : i64} {
  func.func @_statspool_kernel(%arg0: i32, %arg1: i32, %arg2: memref<1x4x8x32xf32, #tpu.memory_space<vmem>>, %arg3: memref<5x8x8xf32, #tpu.memory_space<vmem>>, %arg4: memref<1x9x8x8xf32, #tpu.memory_space<vmem>>) attributes {dimension_semantics = [#tpu.dimension_semantics<parallel>, #tpu.dimension_semantics<parallel>], iteration_bounds = array<i64: 2, 1>, scalar_prefetch = 0 : i64, scratch_operands = 0 : i64, tpu.core_type = #tpu.core_type<tc>, window_params = [{transform_indices = @transform_0, window_bounds = array<i64: 1, 4, 8, 32>}, {transform_indices = @transform_1, window_bounds = array<i64: 5, 8, 8>}, {transform_indices = @transform_2, window_bounds = array<i64: 1, 9, 8, 8>}]} {
    %c0 = arith.constant 0 : index
    %c0_0 = arith.constant 0 : index
    %c0_1 = arith.constant 0 : index
    %c0_2 = arith.constant 0 : index
    %0 = vector.load %arg2[%c0, %c0_0, %c0_1, %c0_2] : memref<1x4x8x32xf32, #tpu.memory_space<vmem>>, vector<1x4x8x32xf32>
    %1 = vector.shape_cast %0 : vector<1x4x8x32xf32> to vector<4x8x32xf32>
    %2 = vector.extract_strided_slice %1 {offsets = [0, 0, 0], sizes = [4, 8, 15], strides = [1, 1, 1]} : vector<4x8x32xf32> to vector<4x8x15xf32>
    %3 = vector.extract_strided_slice %1 {offsets = [0, 0, 1], sizes = [4, 8, 15], strides = [1, 1, 1]} : vector<4x8x32xf32> to vector<4x8x15xf32>
    %4 = arith.maximumf %2, %3 : vector<4x8x15xf32>
    %5 = vector.extract_strided_slice %1 {offsets = [0, 0, 16], sizes = [4, 8, 15], strides = [1, 1, 1]} : vector<4x8x32xf32> to vector<4x8x15xf32>
    %6 = arith.maximumf %4, %5 : vector<4x8x15xf32>
    %7 = vector.extract_strided_slice %1 {offsets = [0, 0, 17], sizes = [4, 8, 15], strides = [1, 1, 1]} : vector<4x8x32xf32> to vector<4x8x15xf32>
    %8 = arith.maximumf %6, %7 : vector<4x8x15xf32>
    %9 = vector.shape_cast %8 : vector<4x8x15xf32> to vector<32x15xf32>
    %10 = tpu.iota {dimensions = array<i32: 0>} : vector<15x8xi32>
    %11 = tpu.iota {dimensions = array<i32: 1>} : vector<15x8xi32>
    %c2_i32 = arith.constant 2 : i32
    %12 = vector.broadcast %c2_i32 : i32 to vector<15x8xi32>
    %13 = arith.muli %11, %12 : vector<15x8xi32>
    %14 = arith.cmpi eq, %10, %13 : vector<15x8xi32>
    %15 = arith.extui %14 : vector<15x8xi1> to vector<15x8xi32>
    %16 = arith.sitofp %15 : vector<15x8xi32> to vector<15x8xf32>
    %cst = arith.constant dense<0.000000e+00> : vector<32x8xf32>
    %17 = tpu.matmul %9, %16, %cst {dimension_numbers = #tpu.dot_dimension_numbers<[1], [0], [0], [1], [0, 0, 1, 1], [], []>, precision = #tpu.contract_precision<fp32>} : vector<32x15xf32>, vector<15x8xf32>, vector<32x8xf32> -> vector<32x8xf32>
    %18 = vector.shape_cast %17 : vector<32x8xf32> to vector<4x8x8xf32>
    %c0_3 = arith.constant 0 : index
    %c0_4 = arith.constant 0 : index
    %c0_5 = arith.constant 0 : index
    %c0_6 = arith.constant 0 : index
    %19 = vector.load %arg4[%c0_3, %c0_4, %c0_5, %c0_6] : memref<1x9x8x8xf32, #tpu.memory_space<vmem>>, vector<1x4x8x8xf32>
    %20 = vector.shape_cast %19 : vector<1x4x8x8xf32> to vector<4x8x8xf32>
    %21 = vector.shape_cast %18 : vector<4x8x8xf32> to vector<1x4x8x8xf32>
    tpu.vector_store %arg4[%c0_3, %c0_4, %c0_5, %c0_6], %21 {strides = array<i32>} : memref<1x9x8x8xf32, #tpu.memory_space<vmem>>, vector<1x4x8x8xf32>,
    %c0_7 = arith.constant 0 : index
    %c0_8 = arith.constant 0 : index
    %c0_9 = arith.constant 0 : index
    %22 = vector.load %arg3[%c0_7, %c0_8, %c0_9] : memref<5x8x8xf32, #tpu.memory_space<vmem>>, vector<5x8x8xf32>
    %c0_10 = arith.constant 0 : index
    %c4 = arith.constant 4 : index
    %c0_11 = arith.constant 0 : index
    %c0_12 = arith.constant 0 : index
    %23 = vector.load %arg4[%c0_10, %c4, %c0_11, %c0_12] : memref<1x9x8x8xf32, #tpu.memory_space<vmem>>, vector<1x5x8x8xf32>
    %24 = vector.shape_cast %23 : vector<1x5x8x8xf32> to vector<5x8x8xf32>
    %25 = vector.shape_cast %22 : vector<5x8x8xf32> to vector<1x5x8x8xf32>
    tpu.vector_store %arg4[%c0_10, %c4, %c0_11, %c0_12], %25 {strides = array<i32>} : memref<1x9x8x8xf32, #tpu.memory_space<vmem>>, vector<1x5x8x8xf32>,
    return
  }
  func.func @transform_0(%arg0: i32, %arg1: i32) -> (i32, i32, i32, i32) {
    %c0_i32 = arith.constant 0 : i32
    %c0_i32_0 = arith.constant 0 : i32
    %c0_i32_1 = arith.constant 0 : i32
    return %arg0, %c0_i32, %arg1, %c0_i32_0 : i32, i32, i32, i32
  }
  func.func @transform_1(%arg0: i32, %arg1: i32) -> (i32, i32, i32) {
    %c0_i32 = arith.constant 0 : i32
    %c0_i32_0 = arith.constant 0 : i32
    %c0_i32_1 = arith.constant 0 : i32
    return %c0_i32, %arg1, %c0_i32_0 : i32, i32, i32
  }
  func.func @transform_2(%arg0: i32, %arg1: i32) -> (i32, i32, i32, i32) {
    %c0_i32 = arith.constant 0 : i32
    %c0_i32_0 = arith.constant 0 : i32
    %c0_i32_1 = arith.constant 0 : i32
    return %arg0, %c0_i32, %arg1, %c0_i32_0 : i32, i32, i32, i32
  }
}

</mosaic_0001>

<bundles_post_ra>
// kernel: tpu_custom_call.1
= control target key start
LH: loop header
LB: loop body
LE: loop exit
PB: predicated region body
PF: predicated region fallthrough
CT: control target
= control target key end

     0   :  { %7 = vsyncpa [#allocation3], 0  ;;  %s1602_s0 = inlined_call_operand.hbm [shape: f32[2,4,8,32], index: 0, kind: input, shape index: {}]   ;;  %s1603_s1 = inlined_call_operand.hbm [shape: f32[5,8,8], index: 1, kind: input, shape index: {}]   ;;  %s1604_s2 = inlined_call_operand.vmem [shape: f32[2,9,8,8], index: 2, kind: output, shape index: {}]  }
   0x1   :  { %9 = vsyncpa [#allocation3 + $0x1], 0 }
   0x2   :  { %10 = vsyncpa [#allocation5], 0  ;;  %s1387_s9 = smov 0   ;;  %s1389_s10 = smov 0  }
   0x3   :  { %s1391_s11 = smov 0   ;;  %s1393_s12 = smov 0  }
   0x4   :  { %s1395_s13 = smov 0   ;;  %s1397_s14 = smov 0  }
   0x5 LB: > { %s1001_s15 = sadd.s32 4294967295, %s1361_s14   ;;  %p50_p0 = scmp.ne.s32.totalorder %s1345_s10, %s1341_s9  ;;  %s1361_s14 = sphi %s1397_s14, %s16_s14   ;;  %s1357_s13 = sphi %s1395_s13, %s1623_s13   ;;  %s1353_s12 = sphi %s1393_s12, %s1622_s12   ;;  %s1349_s11 = sphi %s1391_s11, %s1621_s11   ;;  %s1345_s10 = sphi %s1389_s10, %s1620_s10   ;;  %s1341_s9 = sphi %s1387_s9, %s1619_s9  }
   0x6   : > { %p1417_p1 = scmp.eq.s32.totalorder %s1001_s15, 0  ;;  %p1003_p2 = scmp.ge.s32.totalorder %s1361_s14, 1 }
   0x7   : > { %p115_p3 = scmp.lt.s32.totalorder %s1361_s14, 3  ;;  %s1363_s19 = smov [#allocation4]  }
   0x8   : > { %s1609_s16 = scalar_select %p1417_p1, 1, 0 }
   0x9   : > { %p1425_p4 = por %p1417_p1, %p50_p0  ;;  %p1429_p5 = pnand %p1003_p2, %p115_p3 }
   0xa   : > { %s129_s20 = sshll.u32 %s1363_s19, 4  ;;  %s28_s22 = sadd.s32 1, %s1357_s13  ;;  %s130_s20 = int_to_ptr.vmem [resolvable:$true] %s129_s20 }
   0xb   : > { %s1610_s17 = scalar_select %p1425_p4, 1, 0 }
   0xc   : > { %s1611_s18 = scalar_select %p1429_p5, 1, 0 }
   0xd   : > { %p1182_p6 = pneg %p1429_p5  ;;  %s1249_s25 = scalar_lea.hbm %s1603_s1, 640 }
   0xe   : > { %p1250_p8 = scmp.ne.s32.totalorder %s1603_s1, %s1249_s25  ;;  %p1256_p12 = scmp.lt.u32.totalorder %s1249_s25, %s1603_s1 }
   0xf   : > { %p1437_p7 = pnand %p1182_p6, %p1417_p1 }
  0x11   : > { %p1251_p9 = pneg %p1437_p7 }
  0x13   : > { %p1252_p10 = pnand %p1251_p9, %p1250_p8 }
  0x15   : > { %p1253_p11 = pneg %p1252_p10 }
  0x17   : > { %p1258_p13 = pnand %p1256_p12, %p1253_p11 }
  0x19   : > { %1261 = shalt.err (!%p1258_p13)
}
  0x1a   : > { %s1262_s30 = scalar_lea.vmem %s130_s20, 640  ;;  %p1270_p6 = scmp.lt.s32.totalorder %s130_s20, %s130_s20 }
  0x1b   : > { %p1263_p0 = scmp.ne.s32.totalorder %s130_s20, %s1262_s30  ;;  %p1271_p1 = scmp.lt.s32.totalorder %s1262_s30, %s1262_s30 }
  0x1d   : > { %p1265_p2 = pnand %p1263_p0, %p1251_p9  ;;  %p1272_p4 = por %p1271_p1, %p1270_p6 }
  0x1f   : > { %p1266_p3 = pneg %p1265_p2 }
  0x21   : > { %p1273_p5 = pnand %p1272_p4, %p1266_p3 }
  0x23   : > { %1276 = shalt.err (!%p1273_p5)
}
  0x24   : > { %s1364_s3 = smov 128   ;;  %s1365_s4 = smov 8  }
  0x25   : > { %1185 = dma.hbm_to_vmem [thread:$0]  (!%p1437_p7), %s1603_s1, 640, %s130_s20, [#allocation5], %s1364_s3, %s1364_s3, %s1365_s4  }
  0x26   : > { %p30_p1 = scmp.ge.s32.totalorder %s28_s22, 2  ;;  %s37_s7 = sadd.s32 1, %s1349_s11 }
  0x27   : > { %p44_p4 = scmp.ne.s32.totalorder %s1349_s11, %s1345_s10  ;;  %p45_p5 = scmp.eq.s32.totalorder %s1361_s14, 0 }
  0x28   : > { %s1625_s22 = smov (%p30_p1, %s28_s22), 0  ;;  %p1191_p9 = scmp.lt.s32.totalorder %s1361_s14, 2 }
  0x29   : > { %p46_p8 = por %p45_p5, %p44_p4  ;;  %s32_s8 = ssub.s32 %s1357_s13, %s1625_s22 }
  0x2a   : > { %s143_s9 = sand.u32 1, %s1349_s11   ;;  %p35_p10 = scmp.eq.s32.totalorder %s32_s8, 0 }
  0x2b   : > { %s1006_s15 = sshll.u32 %s143_s9, 5  ;;  %s1028_s19 = sshll.u32 %s1357_s13, 9 }
  0x2c   : > { %s1473_s21 = scalar_select %p35_p10, %s1349_s11, %s37_s7  }
  0x2d   : > { %s1478_s20 = scalar_lea.hbm %s1602_s0, %s1028_s19  ;;  %s147_s25 = scalar_lea.vmem [#allocation2], %s1006_s15 }
  0x2e   : > { %s155_s26 = sshll.u32 %s147_s25, 4  ;;  %p1480_p7 = pnand %p1191_p9, %p46_p8  ;;  %s1484_s26 = int_to_ptr.vmem [resolvable:$true] %s155_s26 }
  0x2f   : > { %s1486_s28 = scalar_lea.sflag [#allocation3], %s143_s9  ;;  %s1277_s29 = scalar_lea.hbm %s1478_s20, 512 }
  0x30   : > { %p1278_p11 = scmp.ne.s32.totalorder %s1478_s20, %s1277_s29  ;;  %p1279_p12 = pneg %p1480_p7 }
  0x31   : > { %s1282_s6 = scalar_lea.hbm %s1602_s0, 1024  ;;  %p1283_p2 = scmp.lt.u32.totalorder %s1478_s20, %s1602_s0 }
  0x32   : > { %p1280_p13 = pnand %p1279_p12, %p1278_p11  ;;  %p1284_p3 = scmp.lt.u32.totalorder %s1282_s6, %s1277_s29 }
  0x33   : > { %p1286_p1 = scmp.lt.u32.totalorder %s1277_s29, %s1478_s20 }
  0x34   : > { %p1281_p0 = pneg %p1280_p13  ;;  %p1285_p6 = por %p1284_p3, %p1283_p2 }
  0x36   : > { %p1287_p4 = por %p1286_p1, %p1285_p6 }
  0x38   : > { %p1288_p5 = pnand %p1287_p4, %p1281_p0 }
  0x3a   : > { %1291 = shalt.err (!%p1288_p5)
}
  0x3b   : > { %s1292_s9 = scalar_lea.vmem %s1484_s26, 512  ;;  %s1366_s15 = smov [#allocation2]  }
  0x3c   : > { %p1293_p8 = scmp.ne.s32.totalorder %s1484_s26, %s1292_s9  ;;  %s1297_s19 = sshll.u32 %s1366_s15, 4  ;;  %s1298_s19 = int_to_ptr.vmem [resolvable:$false] %s1297_s19 }
  0x3d   : > { %s1299_s23 = scalar_lea.vmem %s1298_s19, 1024  ;;  %p1300_p11 = scmp.lt.s32.totalorder %s1484_s26, %s1298_s19 }
  0x3e   : > { %p1295_p9 = pnand %p1293_p8, %p1279_p12  ;;  %p1301_p13 = scmp.lt.s32.totalorder %s1299_s23, %s1292_s9 }
  0x40   : > { %p1296_p10 = pneg %p1295_p9  ;;  %p1302_p2 = por %p1301_p13, %p1300_p11 }
  0x42   : > { %p1303_p3 = pnand %p1302_p2, %p1296_p10 }
  0x44   : > { %1306 = shalt.err (!%p1303_p3)
}
  0x45   : > { %1189 = dma.hbm_to_vmem [thread:$0]  (!%p1480_p7), %s1478_s20, 512, %s1484_s26, %s1486_s28, %s1364_s3, %s1364_s3, %s1365_s4  }
  0x46   : > { %p1614_p12 = scmp.ne.s32.totalorder %s1611_s18, 0 }
  0x47   : > { %s169_s24 = sand.u32 (!%p1614_p12), 1, %s1345_s10   ;;  %p1615_p0 = scmp.ne.s32.totalorder (!%p1614_p12), %s1610_s17, 0 }
  0x48   : > { %167 = sbr.rel (%p1614_p12) target bundleno = 465 (0x1d1), region = 28  ;;  %s1010_s25 = sshll.u32 (!%p1614_p12), %s169_s24, 5 }
  0x49   : > { %s170_s29 = scalar_lea.sflag (!%p1614_p12), [#allocation3], %s169_s24  ;;  %s1520_s30 = scalar_lea.vmem (!%p1614_p12), [#allocation2], %s1010_s25 }
  0x4f   : > { %1332 = dma.done.wait (%p1615_p0), %s170_s29, 512  }
  0x50   : > { %1334 = vsyncadd (%p1615_p0), %s170_s29, 4294966784  ;;  %p1616_p6 = scmp.ne.s32.totalorder %s1609_s16, 0 }
  0x52   : > { %1336 = dma.done.wait (%p1616_p6), [#allocation5], 640  }
  0x53   : > { %1338 = vsyncadd (%p1616_p6), [#allocation5], 4294966656  ;;  %v265_v0 = vlaneseq  ;;  %v209_v5 = vld [vmem:[%s1520_s30] sm:$0xff]  ;;  %s1367_s18 = smov 112   ;;  %s1368_s17 = smov 127   ;;  %v210_v6 = vld [vmem:[%s1520_s30 + $0x8] sm:$0xff] }
  0x54   : > { %233 = vrot.lane.b32.xlu1 %v209_v5, %s1367_s18  ;;  %217 = vrot.lane.b32.xlu0 %v209_v5, %s1368_s17  ;;  %v1369_v7 = vmov 0.0   ;;  %vm290_vm2 = vcmask 1046528   ;;  %v1370_v9 = vmov 1.0   ;;  %v211_v12 = vld [vmem:[%s1520_s30 + $0x10] sm:$0xff]  ;;  %s1371_s16 = smov 111   ;;  %v212_v17 = vld [vmem:[%s1520_s30 + $0x18] sm:$0xff] }
  0x55   : > { %v266_v1 = vshrl.u32 %v265_v0, 7  ;;  %v269_v2 = vand.u32 127, %v265_v0  ;;  %vm277_vm4 = vcmask 121856   ;;  %p201_p7 = scmp.lt.s32.totalorder %s1353_s12, 1  ;;  %vm882_vm5 = vcmask 64512   ;;  %v888_v11 = vld [vmem:[#allocation4 + $0x8] sm:$0xff] }
  0x57   : > { %v267_v3 = vadd.s32 8, %v266_v1  ;;  %v270_v4 = vmul.u32 2, %v269_v2  ;;  %s1627_s12 = smov (!%p201_p7, %s1353_s12), 1 }
  0x58   : > { %235 = vrot.lane.b32.xlu1 %v210_v6, %s1367_s18  ;;  %219 = vrot.lane.b32.xlu0 %v210_v6, %s1368_s17  ;;  %s1175_s3 = smul.u32 72, %s1627_s12 }
  0x59   : > { %vm272_vm0 = vcmp.eq.s32.totalorder %v267_v3, %v270_v4  ;;  %vm271_vm1 = vcmp.eq.s32.totalorder %v266_v1, %v270_v4 }
  0x5a   : > { %v1014_v8 = vsel %vm272_vm0, 1.0, %v1369_v7  ;;  %vm1535_vm3 = vmpackc.low %vm290_vm2, %vm271_vm1  ;;  %v1013_v13 = vsel %vm271_vm1, 1.0, %v1369_v7  ;;  %s208_s26 = scalar_lea.vmem %s1604_s2, %s1175_s3 }
  0x5b   : > { %v1533_v10 = vpack.c.bf16 %v1014_v8, %v1370_v9  ;;  %v292_v14 = vsel %vm290_vm2, %v1014_v8, 0  ;;  %v403_v15 = vsub.f32 %v1013_v13, %v1013_v13  ;;  %v889_v13 = vld [vmem:[#allocation4 + $0x10] sm:$0xff]  ;;  %1022 = vst.msk [vmem:[%s208_s26 + $0x28] sm:$0xff] %vm882_vm5, %v888_v11 }
  0x5c   : > { %249 = vrot.lane.b32.xlu1 %v209_v5, %s1371_s16  ;;  %221 = vrot.lane.b32.xlu0 %v211_v12, %s1368_s17  ;;  %v410_v16 = vsub.f32 %v292_v14, %v292_v14  ;;  %v890_v14 = vld [vmem:[#allocation4 + $0x18] sm:$0xff]  ;;  %1023 = vst.msk [vmem:[%s208_s26 + $0x30] sm:$0xff] %vm882_vm5, %v889_v13 }
  0x5d   : > { %1141 = vmatprep.subr.msk.bf16.mxu0 %vm1535_vm3, %v1533_v10  ;;  %1127 = vmatprep.subr.msk.bf16.mxu1 %vm1535_vm3, %v1533_v10  ;;  %v404_v18 = vand.u32 4294901760, %v403_v15  ;;  %1024 = vst.msk [vmem:[%s208_s26 + $0x38] sm:$0xff] %vm882_vm5, %v890_v14 }
  0x5e   : > { %1144 = vmatpush3.bf16.msk.msra.mxu0 %vm1535_vm3, %v1533_v10  ;;  %1130 = vmatpush3.bf16.msk.msra.mxu1 %vm1535_vm3, %v1533_v10  ;;  %v411_v19 = vand.u32 4294901760, %v410_v16  ;;  %v1556_v26 = vpack.c.bf16 %v410_v16, %v403_v15 }
  0x5f   : > { %v405_v20 = vsub.f32 %v403_v15, %v404_v18  ;;  %v891_v15 = vld [vmem:[#allocation4 + $0x20] sm:$0xff] }
  0x60   : > { %251 = vrot.lane.b32.xlu1 %v210_v6, %s1371_s16  ;;  %223 = vrot.lane.b32.xlu0 %v212_v17, %s1368_s17  ;;  %v412_v21 = vsub.f32 %v410_v16, %v411_v19  ;;  %v1145_v22 = vpack.c.bf16 %v411_v19, %v404_v18  ;;  %1025 = vst.msk [vmem:[%s208_s26 + $0x40] sm:$0xff] %vm882_vm5, %v891_v15 }
  0x61   : > { %v406_v23 = vand.u32 4294901760, %v405_v20 }
  0x62   : > { %v413_v24 = vand.u32 4294901760, %v412_v21  ;;  %1146 = vmatprep.subr.bf16.mxu0 %v1145_v22 }
  0x64   : > { %239 = vrot.lane.b32.xlu1 %v212_v17, %s1367_s18  ;;  %237 = vrot.lane.b32.xlu0 %v211_v12, %s1367_s18  ;;  %v1131_v25 = vpack.c.bf16 %v413_v24, %v406_v23 }
  0x66   : > { %1132 = vmatprep.subr.bf16.mxu1 %v1131_v25 }
  0x68   : > { %255 = vrot.lane.b32.xlu1 %v212_v17, %s1371_s16  ;;  %253 = vrot.lane.b32.xlu0 %v211_v12, %s1371_s16 }
  0xc6   : > { %v234_v27 = vpop.permute.xlu1 %233  ;;  %v218_v28 = vpop.permute.xlu0 %217 }
  0xc7   : > { %v229_v29 = vmax.f32 %v209_v5, %v218_v28 }
  0xc9   : > { %v245_v33 = vmax.f32 %v229_v29, %v234_v27 }
  0xca   : > { %v236_v30 = vpop.permute.xlu1 %235  ;;  %v220_v31 = vpop.permute.xlu0 %219 }
  0xcb   : > { %v230_v32 = vmax.f32 %v210_v6, %v220_v31 }
  0xcd   : > { %v246_v38 = vmax.f32 %v230_v32, %v236_v30 }
  0xce   : > { %v250_v34 = vpop.permute.xlu1 %249  ;;  %v222_v35 = vpop.permute.xlu0 %221 }
  0xcf   : > { %v261_v36 = vmax.f32 %v245_v33, %v250_v34  ;;  %v231_v49 = vmax.f32 %v211_v12, %v222_v35 }
  0xd1   : > { %v279_v37 = vsel %vm277_vm4, %v261_v36, 0 }
  0xd2   : > { %v361_v39 = vand.u32 4294901760, %v279_v37  ;;  %v252_v40 = vpop.permute.xlu1 %251  ;;  %v224_v41 = vpop.permute.xlu0 %223 }
  0xd3   : > { %v262_v42 = vmax.f32 %v246_v38, %v252_v40  ;;  %v232_v50 = vmax.f32 %v212_v17, %v224_v41 }
  0xd4   : > { %v362_v43 = vsub.f32 %v279_v37, %v361_v39 }
  0xd5   : > { %v282_v44 = vsel %vm277_vm4, %v262_v42, 0 }
  0xd6   : > { %v371_v45 = vand.u32 4294901760, %v282_v44  ;;  %v240_v46 = vpop.permute.xlu1 %239  ;;  %v238_v47 = vpop.permute.xlu0 %237  ;;  %v363_v48 = vand.u32 4294901760, %v362_v43 }
  0xd7   : > { %v248_v53 = vmax.f32 %v232_v50, %v240_v46  ;;  %v247_v54 = vmax.f32 %v231_v49, %v238_v47 }
  0xd8   : > { %v372_v51 = vsub.f32 %v282_v44, %v371_v45  ;;  %1099 = vmatprep.mubr.f32.mxu0 %v363_v48  ;;  %v364_v52 = vsub.f32 %v362_v43, %v363_v48 }
  0xda   : > { %v256_v55 = vpop.permute.xlu1 %255  ;;  %v254_v56 = vpop.permute.xlu0 %253  ;;  %v365_v57 = vand.u32 4294901760, %v364_v52  ;;  %v373_v58 = vand.u32 4294901760, %v372_v51 }
  0xdb   : > { %v264_v59 = vmax.f32 %v248_v53, %v256_v55  ;;  %v263_v60 = vmax.f32 %v247_v54, %v254_v56 }
  0xdc   : > { %1069 = vmatprep.mubr.f32.mxu1 %v365_v57  ;;  %1100 = vmatmul.mubr.f32.vlgmr.msra.gmra.mrb[0].mxu0 %v373_v58  ;;  %v374_v61 = vsub.f32 %v372_v51, %v373_v58 }
  0xdd   : > { %v288_v62 = vsel %vm277_vm4, %v264_v59, 0  ;;  %v285_v63 = vsel %vm277_vm4, %v263_v60, 0  ;;  %1148 = vmatpush3.bf16.msra.mxu0 %v1145_v22 }
  0xde   : > { %v391_v0 = vand.u32 4294901760, %v288_v62  ;;  %v381_v1 = vand.u32 4294901760, %v285_v63  ;;  %v375_v2 = vand.u32 4294901760, %v374_v61  ;;  %1151 = vmatprep.subr.msk.bf16.mxu0 %vm1535_vm3, %v1533_v10 }
  0xe0   : > { %v392_v3 = vsub.f32 %v288_v62, %v391_v0  ;;  %v382_v4 = vsub.f32 %v285_v63, %v381_v1  ;;  %1070 = vmatmul.mubr.f32.vlgmr.msra.gmra.mrb[0].mxu1 %v375_v2 }
  0xe1   : > { %1134 = vmatpush3.bf16.msra.mxu1 %v1131_v25 }
  0xe2   : > { %v383_v5 = vand.u32 4294901760, %v382_v4  ;;  %v393_v6 = vand.u32 4294901760, %v392_v3  ;;  %1136 = vmatprep.subr.bf16.mxu1 %v1556_v26 }
  0xe4   : > { %1102 = vmatprep.mubr.f32.mxu0 %v383_v5  ;;  %v384_v7 = vsub.f32 %v382_v4, %v383_v5  ;;  %v394_v8 = vsub.f32 %v392_v3, %v393_v6 }
  0xe5   : > { %1103 = vmatmul.mubr.f32.gmra.mrb[2].mxu0 %v393_v6 }
  0xe6   : > { %1109 = vmatprep.mubr.f32.mxu0 %v361_v39  ;;  %v385_v9 = vand.u32 4294901760, %v384_v7  ;;  %v395_v12 = vand.u32 4294901760, %v394_v8 }
  0xe8   : > { %1072 = vmatprep.mubr.f32.mxu1 %v385_v9 }
  0xe9   : > { %1073 = vmatmul.mubr.f32.gmra.mrb[2].mxu1 %v395_v12  ;;  %1110 = vmatmul.mubr.f32.vlgmr.msra.gmra.mrb[0].mxu0 %v371_v45 }
  0xea   : > { %1079 = vmatprep.mubr.f32.mxu1 %v361_v39  ;;  %1112 = vmatprep.mubr.f32.mxu0 %v381_v1 }
  0xeb   : > { %1154 = vmatpush3.bf16.msk.msra.mxu0 %vm1535_vm3, %v1533_v10  ;;  %v887_v10 = vld [vmem:[#allocation4] sm:$0xff] }
  0xec   : > { %1021 = vst.msk [vmem:[%s208_s26 + $0x20] sm:$0xff] %vm882_vm5, %v887_v10 }
  0xed   : > { %1080 = vmatmul.mubr.f32.vlgmr.msra.gmra.mrb[0].mxu1 %v371_v45  ;;  %1113 = vmatmul.mubr.f32.gmra.mrb[2].mxu0 %v391_v0 }
  0xee   : > { %1138 = vmatpush3.bf16.msra.mxu1 %v1556_v26  ;;  %1082 = vmatprep.mubr.f32.mxu1 %v381_v1 }
  0xef   : > { %1119 = vmatprep.mubr.f32.mxu0 %v361_v39 }
  0xf1   : > { %1083 = vmatmul.mubr.f32.gmra.mrb[2].mxu1 %v391_v0  ;;  %1120 = vmatmul.mubr.f32.vlgmr.msra.gmra.mrb[0].mxu0 %v371_v45 }
  0xf2   : > { %1089 = vmatprep.mubr.f32.mxu1 %v362_v43  ;;  %1122 = vmatprep.mubr.f32.mxu0 %v381_v1 }
  0xf5   : > { %1090 = vmatmul.mubr.f32.vlgmr.msra.gmra.mrb[0].mxu1 %v372_v51  ;;  %1123 = vmatmul.mubr.f32.gmra.mrb[2].mxu0 %v391_v0 }
  0xf6   : > { %1092 = vmatprep.mubr.f32.mxu1 %v382_v4 }
  0xf9   : > { %1093 = vmatmul.mubr.f32.gmra.mrb[2].mxu1 %v392_v3 }
 0x1c4   : > { %v1121_v16 = vpop.f32.mrb[0].mxu0 }
 0x1c5   : > { %v860_v17 = vpop.f32.mrb[1].mxu0 }
 0x1c8   : > { %v1091_v18 = vpop.f32.mrb[0].mxu1  ;;  %v1124_v19 = vpop.f32.mrb[2].mxu0 }
 0x1c9   : > { %v1155_v20 = vadd.f32 %v1121_v16, %v1091_v18  ;;  %v572_v21 = vpop.f32.mrb[1].mxu1  ;;  %v872_v22 = vpop.f32.mrb[3].mxu0 }
 0x1ca   : > { %v1156_v23 = vadd.f32 %v860_v17, %v572_v21 }
 0x1cb   : > { %884 = vst.msk [vmem:[%s208_s26 + $0x8] sm:$0xff] %vm882_vm5, %v1155_v20 }
 0x1cc   : > { %883 = vst.msk [vmem:[%s208_s26] sm:$0xff] %vm882_vm5, %v1156_v23  ;;  %v1094_v24 = vpop.f32.mrb[2].mxu1 }
 0x1cd   : > { %v1157_v25 = vadd.f32 %v1124_v19, %v1094_v24  ;;  %v586_v26 = vpop.f32.mrb[3].mxu1 }
 0x1ce   : > { %v1158_v27 = vadd.f32 %v872_v22, %v586_v26 }
 0x1cf   : > { %886 = vst.msk [vmem:[%s208_s26 + $0x18] sm:$0xff] %vm882_vm5, %v1157_v25 }
 0x1d0   : > { %885 = vst.msk [vmem:[%s208_s26 + $0x10] sm:$0xff] %vm882_vm5, %v1158_v27 }
 0x1d1 PF: > { %s16_s14 = sadd.s32 1, %s1361_s14   ;;  %s1619_s9 = smov %s1345_s10 }
 0x1d2   : > { %p13_p1 = scmp.ge.s32.totalorder %s16_s14, 4   ;;  %s1620_s10 = smov %s1349_s11 }
 0x1d3   : > { %s1621_s11 = smov %s1473_s21  ;;  %s1622_s12 = smov %s1357_s13 }
 0x1d4   : > { %s1623_s13 = smov %s1625_s22  ;;  %15 = sbr.rel (!%p13_p1) target bundleno = 5 (0x5), region = 74 }
 0x1db   :  { %925 = vsyncpa [#allocation3], 1 }
 0x1dc   :  { %927 = vsyncpa [#allocation3 + $0x1], 1 }
 0x1dd   :  { %928 = vsyncpa [#allocation5], 1 }

</bundles_post_ra>
